<compile_context>
chip_gen: v7x
topology: tpu7x:2x2x1
jax: 0.10.0
libtpu: 0.0.40
codegen_flags: <defaults>
</compile_context>

<pallas_src>
import jax
import jax.numpy as jnp
from jax.experimental import pallas as pl
from jax.experimental.pallas import tpu as pltpu


RRELU_SLOPE = (1.0 / 8.0 + 1.0 / 3.0) / 2.0  # F.rrelu default lower/upper, eval mode


def _rrelu(v):
    return jnp.where(v >= 0, v, v * RRELU_SLOPE)


def _round_up(n, m):
    return ((n + m - 1) // m) * m


def _cdiv(a, b):
    return -(-a // b)


def mlp_kernel(
    x_ref,
    w0_ref, b0_ref,
    w1_ref, b1_ref,
    w2_ref, b2_ref,
    w3_ref, b3_ref,
    w4_ref, b4_ref,
    o_ref,
):
    cdt = w0_ref.dtype  # MXU compute dtype (bf16 or f32)

    # f32 rows -> compute dtype in-register (no separate HBM pad/cast pass).
    h = x_ref[...].astype(cdt)

    # input layer + rrelu (f32 accumulate, fused epilogue -> bf16 activation)
    h = _rrelu(jnp.dot(h, w0_ref[...], preferred_element_type=jnp.float32)
               + b0_ref[...]).astype(cdt)
    # hidden1 (BN folded) + rrelu   (dropout == identity in eval)
    h = _rrelu(jnp.dot(h, w1_ref[...], preferred_element_type=jnp.float32)
               + b1_ref[...]).astype(cdt)
    # hidden2 (BN folded) + rrelu
    h = _rrelu(jnp.dot(h, w2_ref[...], preferred_element_type=jnp.float32)
               + b2_ref[...]).astype(cdt)
    # hidden3 (BN folded) + rrelu
    h = _rrelu(jnp.dot(h, w3_ref[...], preferred_element_type=jnp.float32)
               + b3_ref[...]).astype(cdt)
    # output layer: real 2-wide logits written directly (slice fused away)
    o_ref[...] = (jnp.dot(h, w4_ref[...], preferred_element_type=jnp.float32)
                  + b4_ref[...])


def net_forward(x, params, *, tile_b=None, compute_dtype=jnp.bfloat16):
    """Run the whole MLP forward pass as a batch-tiled Pallas kernel.

    x: (B, input_size) float32
    params: dict of weights / biases / BN stats (see init_params)
    tile_b: batch tile; None -> chosen from VMEM capacity / batch size.
    """
    eps = 1e-5

    def fold(bn):
        gamma, beta, mean, var = bn
        scale = gamma * jax.lax.rsqrt(var + eps)
        return scale, beta - mean * scale

    w0, b0 = params["w0"], params["b0"]
    w1, b1 = params["w1"], params["b1"]
    w2, b2 = params["w2"], params["b2"]
    w3, b3 = params["w3"], params["b3"]
    w4, b4 = params["w4"], params["b4"]

    # Fold eval-mode BatchNorm1d into the preceding Linear (column scale+shift).
    s1, t1 = fold(params["bn1"]); w1 = w1 * s1[None, :]; b1 = b1 * s1 + t1
    s2, t2 = fold(params["bn2"]); w2 = w2 * s2[None, :]; b2 = b2 * s2 + t2
    s3, t3 = fold(params["bn3"]); w3 = w3 * s3[None, :]; b3 = b3 * s3 + t3

    B, in_f = x.shape
    n_out = w4.shape[1]

    # Hidden dims padded to 128 lanes (lane-dense intermediates, tiny one-time
    # cost on the small weight tensors). x / output stay at their true widths.
    d_h1 = _round_up(w0.shape[1], 128)
    d_h2 = _round_up(w1.shape[1], 128)

    def pad2(w, rows, cols):
        return jnp.pad(w, ((0, rows - w.shape[0]),
                           (0, cols - w.shape[1]))).astype(compute_dtype)

    def pad1(b, cols):
        return jnp.pad(b, (0, cols - b.shape[0]))[None, :].astype(jnp.float32)

    weights = (
        pad2(w0, in_f, d_h1), pad1(b0, d_h1),
        pad2(w1, d_h1, d_h2), pad1(b1, d_h2),
        pad2(w2, d_h2, d_h2), pad1(b2, d_h2),
        pad2(w3, d_h2, d_h1), pad1(b3, d_h1),
        pad2(w4, d_h1, n_out), pad1(b4, n_out),
    )
    bytes_w = sum(int(a.size) * a.dtype.itemsize for a in weights)

    # ---- generation-aware tiling & VMEM budgeting ---------------------------
    try:
        vmem_cap = int(pltpu.get_tpu_info().vmem_capacity_bytes)
    except Exception:
        vmem_cap = 64 * 2**20  # conservative (v7x-sized) fallback

    lane = lambda d: _round_up(d, 128)
    # VMEM bytes per batch row: double-buffered f32 x tile, live f32+bf16
    # activations, one extra f32 temp, double-buffered f32 out tile.
    per_row = (2 * lane(in_f) * 4
               + (d_h1 + d_h2) * 6
               + max(d_h1, d_h2) * 4
               + 2 * lane(n_out) * 4)
    small_vmem = vmem_cap <= 80 * 2**20          # v7x-class chip
    gen_cap = 2048 if small_vmem else 4096       # per-step overhead amortization
    budget = vmem_cap // 2 - 2 * bytes_w - (4 << 20)
    mem_cap = max(64, (budget // per_row) // 8 * 8)
    tile_cap = min(gen_cap, mem_cap)

    if tile_b is None:
        # >=2 grid steps on 2-TensorCore chips so "parallel" actually shards.
        min_tiles = 2 if (small_vmem and B >= 512) else 1
        n_tiles = max(min_tiles, _cdiv(B, tile_cap))
        tile_b = _round_up(_cdiv(B, n_tiles), 8)
    else:
        tile_b = _round_up(max(8, int(tile_b)), 8)
    if tile_b >= B:
        # Never use a block taller than the array; B itself is a legal block.
        tile_b = B if (B % 8 == 0 or B < 8) else (B // 8) * 8
    n_tiles = _cdiv(B, tile_b)
    grid = (n_tiles,)

    vmem_needed = tile_b * per_row + 2 * bytes_w + (2 << 20)
    vmem_limit = int(min(max(vmem_needed, 32 * 2**20), vmem_cap - 8 * 2**20))

    x_spec = pl.BlockSpec((tile_b, in_f), lambda i: (i, 0))
    out_spec = pl.BlockSpec((tile_b, n_out), lambda i: (i, 0))
    # Constant index_map -> weights/biases stay VMEM-resident across the grid.
    const_specs = [pl.BlockSpec(a.shape, lambda i: (0, 0)) for a in weights]

    flops = 2 * n_tiles * tile_b * (
        in_f * d_h1 + d_h1 * d_h2 + d_h2 * d_h2 + d_h2 * d_h1 + d_h1 * n_out)
    bytes_accessed = B * in_f * 4 + bytes_w + B * n_out * 4

    out = pl.pallas_call(
        mlp_kernel,
        out_shape=jax.ShapeDtypeStruct((B, n_out), jnp.float32),
        grid=grid,
        in_specs=[x_spec] + const_specs,
        out_specs=out_spec,
        compiler_params=pltpu.CompilerParams(
            dimension_semantics=("parallel",),
            vmem_limit_bytes=vmem_limit,
        ),
        cost_estimate=pl.CostEstimate(
            flops=int(flops), transcendentals=0,
            bytes_accessed=int(bytes_accessed)),
    )(x, *weights)

    return out


def init_params(key, input_size, h1, h2):
    """Parameter init mimicking PyTorch nn.Linear defaults (uniform in
    +/- 1/sqrt(fan_in)); BatchNorm stats perturbed so the BN fold is exercised."""
    def linear(key, fan_in, fan_out):
        kw, kb = jax.random.split(key)
        bound = 1.0 / jnp.sqrt(jnp.float32(fan_in))
        w = jax.random.uniform(kw, (fan_in, fan_out), jnp.float32, -bound, bound)
        b = jax.random.uniform(kb, (fan_out,), jnp.float32, -bound, bound)
        return w, b

    def bn(key, n):
        k1, k2, k3, k4 = jax.random.split(key, 4)
        return (
            1.0 + 0.1 * jax.random.normal(k1, (n,), jnp.float32),   # gamma
            0.1 * jax.random.normal(k2, (n,), jnp.float32),         # beta
            0.1 * jax.random.normal(k3, (n,), jnp.float32),         # running_mean
            1.0 + 0.1 * jax.random.uniform(k4, (n,), jnp.float32),  # running_var
        )

    k0, k1, k2, k3, k4, kb1, kb2, kb3 = jax.random.split(key, 8)
    w0, b0 = linear(k0, input_size, h1)   # self.input
    w1, b1 = linear(k1, h1, h2)           # self.hidden1
    w2, b2 = linear(k2, h2, h2)           # self.hidden2
    w3, b3 = linear(k3, h2, h1)           # self.hidden3
    w4, b4 = linear(k4, h1, 2)            # self.output

    return dict(
        w0=w0, b0=b0,
        w1=w1, b1=b1, bn1=bn(kb1, h2),
        w2=w2, b2=b2, bn2=bn(kb2, h2),
        w3=w3, b3=b3, bn3=bn(kb3, h1),
        w4=w4, b4=b4,
    )


def reference_forward(x, params):
    """Plain-JAX f32 reference (unfolded BN) for correctness checking."""
    eps = 1e-5

    def fold(bn):
        gamma, beta, mean, var = bn
        scale = gamma / jnp.sqrt(var + eps)
        return scale, beta - mean * scale

    h = _rrelu(x @ params["w0"] + params["b0"])
    for wi, bi, bni in (("w1", "b1", "bn1"), ("w2", "b2", "bn2"), ("w3", "b3", "bn3")):
        s, t = fold(params[bni])
        h = _rrelu((h @ params[wi] + params[bi]) * s + t)
    return h @ params["w4"] + params["b4"]


if __name__ == "__main__":
    # Small shapes consistent with the module (input_size, hidden_units_1,
    # hidden_units_2 are constructor args; defaults 750/200/400 scaled down).
    batch, input_size, h1, h2 = 8, 96, 32, 64

    key = jax.random.PRNGKey(0)
    kx, kp = jax.random.split(key)
    x = jax.random.normal(kx, (batch, input_size), jnp.float32)
    params = init_params(kp, input_size, h1, h2)

    ref = reference_forward(x, params)

    # f32 path: must match the reference tightly.
    out_f32 = jax.block_until_ready(
        net_forward(x, params, compute_dtype=jnp.float32)
    )
    assert out_f32.shape == (batch, 2)
    assert jnp.allclose(out_f32, ref, atol=1e-4, rtol=1e-4), "f32 mismatch vs reference"

    # bf16 path (default, production config): looser tolerance for bf16 drift.
    out_bf16 = jax.block_until_ready(net_forward(x, params))
    assert out_bf16.shape == (batch, 2)
    assert jnp.allclose(out_bf16, ref, atol=5e-2, rtol=5e-2), "bf16 mismatch vs reference"

    # Ragged-grid path (B not a tile multiple): exercises boundary clipping
    # (no wrapper-side batch padding is ever materialized).
    x2 = jax.random.normal(jax.random.PRNGKey(1), (20, input_size), jnp.float32)
    ref2 = reference_forward(x2, params)
    out2 = jax.block_until_ready(
        net_forward(x2, params, tile_b=16, compute_dtype=jnp.float32)
    )
    assert out2.shape == (20, 2)
    assert jnp.allclose(out2, ref2, atol=1e-4, rtol=1e-4), "ragged mismatch vs reference"

    print("KERNEL_OK")
</pallas_src>

<mosaic_0001>
module attributes {stable_mosaic.version = 11 : i64} {
  func.func @mlp_kernel(%arg0: i32, %arg1: memref<8x96xf32, #tpu.memory_space<vmem>>, %arg2: memref<96x128xf32, #tpu.memory_space<vmem>>, %arg3: memref<1x128xf32, #tpu.memory_space<vmem>>, %arg4: memref<128x128xf32, #tpu.memory_space<vmem>>, %arg5: memref<1x128xf32, #tpu.memory_space<vmem>>, %arg6: memref<128x128xf32, #tpu.memory_space<vmem>>, %arg7: memref<1x128xf32, #tpu.memory_space<vmem>>, %arg8: memref<128x128xf32, #tpu.memory_space<vmem>>, %arg9: memref<1x128xf32, #tpu.memory_space<vmem>>, %arg10: memref<128x2xf32, #tpu.memory_space<vmem>>, %arg11: memref<1x2xf32, #tpu.memory_space<vmem>>, %arg12: memref<8x2xf32, #tpu.memory_space<vmem>>) attributes {dimension_semantics = [#tpu.dimension_semantics<parallel>], iteration_bounds = array<i64: 1>, scalar_prefetch = 0 : i64, scratch_operands = 0 : i64, tpu.core_type = #tpu.core_type<tc>, window_params = [{transform_indices = @transform_0, window_bounds = array<i64: 8, 96>}, {pipeline_mode = #tpu.pipeline_mode<synchronous>, transform_indices = @transform_1, window_bounds = array<i64: 96, 128>}, {pipeline_mode = #tpu.pipeline_mode<synchronous>, transform_indices = @transform_2, window_bounds = array<i64: 1, 128>}, {pipeline_mode = #tpu.pipeline_mode<synchronous>, transform_indices = @transform_3, window_bounds = array<i64: 128, 128>}, {pipeline_mode = #tpu.pipeline_mode<synchronous>, transform_indices = @transform_4, window_bounds = array<i64: 1, 128>}, {pipeline_mode = #tpu.pipeline_mode<synchronous>, transform_indices = @transform_5, window_bounds = array<i64: 128, 128>}, {pipeline_mode = #tpu.pipeline_mode<synchronous>, transform_indices = @transform_6, window_bounds = array<i64: 1, 128>}, {pipeline_mode = #tpu.pipeline_mode<synchronous>, transform_indices = @transform_7, window_bounds = array<i64: 128, 128>}, {pipeline_mode = #tpu.pipeline_mode<synchronous>, transform_indices = @transform_8, window_bounds = array<i64: 1, 128>}, {pipeline_mode = #tpu.pipeline_mode<synchronous>, transform_indices = @transform_9, window_bounds = array<i64: 128, 2>}, {pipeline_mode = #tpu.pipeline_mode<synchronous>, transform_indices = @transform_10, window_bounds = array<i64: 1, 2>}, {transform_indices = @transform_11, window_bounds = array<i64: 8, 2>}]} {
    %c0 = arith.constant 0 : index
    %c0_0 = arith.constant 0 : index
    %0 = vector.load %arg1[%c0, %c0_0] : memref<8x96xf32, #tpu.memory_space<vmem>>, vector<8x96xf32>
    %c0_1 = arith.constant 0 : index
    %c0_2 = arith.constant 0 : index
    %1 = vector.load %arg2[%c0_1, %c0_2] : memref<96x128xf32, #tpu.memory_space<vmem>>, vector<96x128xf32>
    %cst = arith.constant dense<0.000000e+00> : vector<8x128xf32>
    %2 = tpu.matmul %0, %1, %cst {dimension_numbers = #tpu.dot_dimension_numbers<[1], [0], [0], [1], [0, 0, 1, 1], [], []>} : vector<8x96xf32>, vector<96x128xf32>, vector<8x128xf32> -> vector<8x128xf32>
    %c0_3 = arith.constant 0 : index
    %c0_4 = arith.constant 0 : index
    %3 = vector.load %arg3[%c0_3, %c0_4] : memref<1x128xf32, #tpu.memory_space<vmem>>, vector<1x128xf32>
    %4 = vector.broadcast %3 : vector<1x128xf32> to vector<8x128xf32>
    %5 = arith.addf %2, %4 : vector<8x128xf32>
    %cst_5 = arith.constant 0.000000e+00 : f32
    %6 = vector.broadcast %cst_5 : f32 to vector<8x128xf32>
    %7 = arith.cmpf oge, %5, %6 : vector<8x128xf32>
    %cst_6 = arith.constant 0.229166672 : f32
    %8 = vector.broadcast %cst_6 : f32 to vector<8x128xf32>
    %9 = arith.mulf %5, %8 : vector<8x128xf32>
    %10 = arith.select %7, %5, %9 : vector<8x128xi1>, vector<8x128xf32>
    %c0_7 = arith.constant 0 : index
    %c0_8 = arith.constant 0 : index
    %11 = vector.load %arg4[%c0_7, %c0_8] : memref<128x128xf32, #tpu.memory_space<vmem>>, vector<128x128xf32>
    %cst_9 = arith.constant dense<0.000000e+00> : vector<8x128xf32>
    %12 = tpu.matmul %10, %11, %cst_9 {dimension_numbers = #tpu.dot_dimension_numbers<[1], [0], [0], [1], [0, 0, 1, 1], [], []>} : vector<8x128xf32>, vector<128x128xf32>, vector<8x128xf32> -> vector<8x128xf32>
    %c0_10 = arith.constant 0 : index
    %c0_11 = arith.constant 0 : index
    %13 = vector.load %arg5[%c0_10, %c0_11] : memref<1x128xf32, #tpu.memory_space<vmem>>, vector<1x128xf32>
    %14 = vector.broadcast %13 : vector<1x128xf32> to vector<8x128xf32>
    %15 = arith.addf %12, %14 : vector<8x128xf32>
    %cst_12 = arith.constant 0.000000e+00 : f32
    %16 = vector.broadcast %cst_12 : f32 to vector<8x128xf32>
    %17 = arith.cmpf oge, %15, %16 : vector<8x128xf32>
    %cst_13 = arith.constant 0.229166672 : f32
    %18 = vector.broadcast %cst_13 : f32 to vector<8x128xf32>
    %19 = arith.mulf %15, %18 : vector<8x128xf32>
    %20 = arith.select %17, %15, %19 : vector<8x128xi1>, vector<8x128xf32>
    %c0_14 = arith.constant 0 : index
    %c0_15 = arith.constant 0 : index
    %21 = vector.load %arg6[%c0_14, %c0_15] : memref<128x128xf32, #tpu.memory_space<vmem>>, vector<128x128xf32>
    %cst_16 = arith.constant dense<0.000000e+00> : vector<8x128xf32>
    %22 = tpu.matmul %20, %21, %cst_16 {dimension_numbers = #tpu.dot_dimension_numbers<[1], [0], [0], [1], [0, 0, 1, 1], [], []>} : vector<8x128xf32>, vector<128x128xf32>, vector<8x128xf32> -> vector<8x128xf32>
    %c0_17 = arith.constant 0 : index
    %c0_18 = arith.constant 0 : index
    %23 = vector.load %arg7[%c0_17, %c0_18] : memref<1x128xf32, #tpu.memory_space<vmem>>, vector<1x128xf32>
    %24 = vector.broadcast %23 : vector<1x128xf32> to vector<8x128xf32>
    %25 = arith.addf %22, %24 : vector<8x128xf32>
    %cst_19 = arith.constant 0.000000e+00 : f32
    %26 = vector.broadcast %cst_19 : f32 to vector<8x128xf32>
    %27 = arith.cmpf oge, %25, %26 : vector<8x128xf32>
    %cst_20 = arith.constant 0.229166672 : f32
    %28 = vector.broadcast %cst_20 : f32 to vector<8x128xf32>
    %29 = arith.mulf %25, %28 : vector<8x128xf32>
    %30 = arith.select %27, %25, %29 : vector<8x128xi1>, vector<8x128xf32>
    %c0_21 = arith.constant 0 : index
    %c0_22 = arith.constant 0 : index
    %31 = vector.load %arg8[%c0_21, %c0_22] : memref<128x128xf32, #tpu.memory_space<vmem>>, vector<128x128xf32>
    %cst_23 = arith.constant dense<0.000000e+00> : vector<8x128xf32>
    %32 = tpu.matmul %30, %31, %cst_23 {dimension_numbers = #tpu.dot_dimension_numbers<[1], [0], [0], [1], [0, 0, 1, 1], [], []>} : vector<8x128xf32>, vector<128x128xf32>, vector<8x128xf32> -> vector<8x128xf32>
    %c0_24 = arith.constant 0 : index
    %c0_25 = arith.constant 0 : index
    %33 = vector.load %arg9[%c0_24, %c0_25] : memref<1x128xf32, #tpu.memory_space<vmem>>, vector<1x128xf32>
    %34 = vector.broadcast %33 : vector<1x128xf32> to vector<8x128xf32>
    %35 = arith.addf %32, %34 : vector<8x128xf32>
    %cst_26 = arith.constant 0.000000e+00 : f32
    %36 = vector.broadcast %cst_26 : f32 to vector<8x128xf32>
    %37 = arith.cmpf oge, %35, %36 : vector<8x128xf32>
    %cst_27 = arith.constant 0.229166672 : f32
    %38 = vector.broadcast %cst_27 : f32 to vector<8x128xf32>
    %39 = arith.mulf %35, %38 : vector<8x128xf32>
    %40 = arith.select %37, %35, %39 : vector<8x128xi1>, vector<8x128xf32>
    %c0_28 = arith.constant 0 : index
    %c0_29 = arith.constant 0 : index
    %41 = vector.load %arg10[%c0_28, %c0_29] : memref<128x2xf32, #tpu.memory_space<vmem>>, vector<128x2xf32>
    %cst_30 = arith.constant dense<0.000000e+00> : vector<8x2xf32>
    %42 = tpu.matmul %40, %41, %cst_30 {dimension_numbers = #tpu.dot_dimension_numbers<[1], [0], [0], [1], [0, 0, 1, 1], [], []>} : vector<8x128xf32>, vector<128x2xf32>, vector<8x2xf32> -> vector<8x2xf32>
    %c0_31 = arith.constant 0 : index
    %c0_32 = arith.constant 0 : index
    %43 = vector.load %arg11[%c0_31, %c0_32] : memref<1x2xf32, #tpu.memory_space<vmem>>, vector<1x2xf32>
    %44 = vector.broadcast %43 : vector<1x2xf32> to vector<8x2xf32>
    %45 = arith.addf %42, %44 : vector<8x2xf32>
    %c0_33 = arith.constant 0 : index
    %c0_34 = arith.constant 0 : index
    %46 = vector.load %arg12[%c0_33, %c0_34] : memref<8x2xf32, #tpu.memory_space<vmem>>, vector<8x2xf32>
    tpu.vector_store %arg12[%c0_33, %c0_34], %45 {strides = array<i32>} : memref<8x2xf32, #tpu.memory_space<vmem>>, vector<8x2xf32>,
    return
  }
  func.func @transform_0(%arg0: i32) -> (i32, i32) {
    %c0_i32 = arith.constant 0 : i32
    %c0_i32_0 = arith.constant 0 : i32
    return %arg0, %c0_i32 : i32, i32
  }
  func.func @transform_1(%arg0: i32) -> (i32, i32) {
    %c0_i32 = arith.constant 0 : i32
    %c0_i32_0 = arith.constant 0 : i32
    %c0_i32_1 = arith.constant 0 : i32
    return %c0_i32, %c0_i32_0 : i32, i32
  }
  func.func @transform_2(%arg0: i32) -> (i32, i32) {
    %c0_i32 = arith.constant 0 : i32
    %c0_i32_0 = arith.constant 0 : i32
    %c0_i32_1 = arith.constant 0 : i32
    return %c0_i32, %c0_i32_0 : i32, i32
  }
  func.func @transform_3(%arg0: i32) -> (i32, i32) {
    %c0_i32 = arith.constant 0 : i32
    %c0_i32_0 = arith.constant 0 : i32
    %c0_i32_1 = arith.constant 0 : i32
    return %c0_i32, %c0_i32_0 : i32, i32
  }
  func.func @transform_4(%arg0: i32) -> (i32, i32) {
    %c0_i32 = arith.constant 0 : i32
    %c0_i32_0 = arith.constant 0 : i32
    %c0_i32_1 = arith.constant 0 : i32
    return %c0_i32, %c0_i32_0 : i32, i32
  }
  func.func @transform_5(%arg0: i32) -> (i32, i32) {
    %c0_i32 = arith.constant 0 : i32
    %c0_i32_0 = arith.constant 0 : i32
    %c0_i32_1 = arith.constant 0 : i32
    return %c0_i32, %c0_i32_0 : i32, i32
  }
  func.func @transform_6(%arg0: i32) -> (i32, i32) {
    %c0_i32 = arith.constant 0 : i32
    %c0_i32_0 = arith.constant 0 : i32
    %c0_i32_1 = arith.constant 0 : i32
    return %c0_i32, %c0_i32_0 : i32, i32
  }
  func.func @transform_7(%arg0: i32) -> (i32, i32) {
    %c0_i32 = arith.constant 0 : i32
    %c0_i32_0 = arith.constant 0 : i32
    %c0_i32_1 = arith.constant 0 : i32
    return %c0_i32, %c0_i32_0 : i32, i32
  }
  func.func @transform_8(%arg0: i32) -> (i32, i32) {
    %c0_i32 = arith.constant 0 : i32
    %c0_i32_0 = arith.constant 0 : i32
    %c0_i32_1 = arith.constant 0 : i32
    return %c0_i32, %c0_i32_0 : i32, i32
  }
  func.func @transform_9(%arg0: i32) -> (i32, i32) {
    %c0_i32 = arith.constant 0 : i32
    %c0_i32_0 = arith.constant 0 : i32
    %c0_i32_1 = arith.constant 0 : i32
    return %c0_i32, %c0_i32_0 : i32, i32
  }
  func.func @transform_10(%arg0: i32) -> (i32, i32) {
    %c0_i32 = arith.constant 0 : i32
    %c0_i32_0 = arith.constant 0 : i32
    %c0_i32_1 = arith.constant 0 : i32
    return %c0_i32, %c0_i32_0 : i32, i32
  }
  func.func @transform_11(%arg0: i32) -> (i32, i32) {
    %c0_i32 = arith.constant 0 : i32
    %c0_i32_0 = arith.constant 0 : i32
    return %arg0, %c0_i32 : i32, i32
  }
}

</mosaic_0001>

<bundles_post_ra>
// kernel: tpu_custom_call.1
= control target key start
LH: loop header
LB: loop body
LE: loop exit
PB: predicated region body
PF: predicated region fallthrough
CT: control target
= control target key end

     0   :  { %16 = vsyncpa [#allocation3], 0  ;;  %s1296_s0 = inlined_call_operand.vmem [shape: f32[8,96], index: 0, kind: input, shape index: {}]   ;;  %s1297_s1 = inlined_call_operand.hbm [shape: f32[96,128], index: 1, kind: input, shape index: {}]   ;;  %s1298_s2 = inlined_call_operand.vmem [shape: f32[1,128], index: 2, kind: input, shape index: {}]   ;;  %s1299_s3 = inlined_call_operand.vmem [shape: f32[128,128], index: 3, kind: input, shape index: {}]   ;;  %s1300_s4 = inlined_call_operand.vmem [shape: f32[1,128], index: 4, kind: input, shape index: {}]   ;;  %s1301_s5 = inlined_call_operand.hbm [shape: f32[128,128], index: 5, kind: input, shape index: {}]   ;;  %s1302_s6 = inlined_call_operand.vmem [shape: f32[1,128], index: 6, kind: input, shape index: {}]   ;;  %s1303_s7 = inlined_call_operand.hbm [shape: f32[128,128], index: 7, kind: input, shape index: {}]   ;;  %s1304_s8 = inlined_call_operand.vmem [shape: f32[1,128], index: 8, kind: input, shape index: {}]   ;;  %s1305_s9 = inlined_call_operand.vmem [shape: f32[128,2], index: 9, kind: input, shape index: {}]   ;;  %s1306_s10 = inlined_call_operand.vmem [shape: f32[1,2], index: 10, kind: input, shape index: {}]   ;;  %s1307_s11 = inlined_call_operand.vmem [shape: f32[8,2], index: 11, kind: output, shape index: {}]  }
   0x1   :  { %17 = vsyncpa [#allocation5], 0  ;;  %s1011_s17 = smov [#allocation4]   ;;  %s1012_s19 = smov [#allocation2]  }
   0x2   :  { %s43_s18 = sshll.u32 %s1011_s17, 4  ;;  %s25_s20 = sshll.u32 %s1012_s19, 4  ;;  %s44_s18 = int_to_ptr.vmem [resolvable:$true] %s43_s18  ;;  %s1079_s20 = int_to_ptr.vmem [resolvable:$true] %s25_s20 }
   0x3   :  { %s941_s23 = scalar_lea.hbm %s1301_s5, 2048 }
   0x4   :  { %p942_p0 = scmp.ne.s32.totalorder %s1301_s5, %s941_s23  ;;  %p945_p1 = scmp.lt.u32.totalorder %s941_s23, %s1301_s5 }
   0x6   :  { %p947_p2 = pnand %p945_p1, %p942_p0 }
   0x8   :  { %950 = shalt.err (!%p947_p2)
}
   0x9   :  { %s951_s28 = scalar_lea.vmem %s44_s18, 2048  ;;  %p956_p4 = scmp.lt.s32.totalorder %s44_s18, %s44_s18 }
   0xa   :  { %p952_p3 = scmp.ne.s32.totalorder %s44_s18, %s951_s28  ;;  %p957_p5 = scmp.lt.s32.totalorder %s951_s28, %s951_s28 }
   0xc   :  { %p958_p6 = por %p957_p5, %p956_p4 }
   0xe   :  { %p959_p7 = pnand %p958_p6, %p952_p3 }
  0x10   :  { %962 = shalt.err (!%p959_p7)
}
  0x11   :  { %s1013_s29 = smov 128   ;;  %s1014_s30 = smov 8  }
  0x12   :  { %49 = dma.hbm_to_vmem [thread:$0]  %s1301_s5, 2048, %s44_s18, [#allocation5], %s1013_s29, %s1013_s29, %s1014_s30  }
  0x13   :  { %s963_s16 = scalar_lea.hbm %s1297_s1, 1536 }
  0x14   :  { %p964_p8 = scmp.ne.s32.totalorder %s1297_s1, %s963_s16  ;;  %p967_p9 = scmp.lt.u32.totalorder %s963_s16, %s1297_s1 }
  0x16   :  { %p969_p10 = pnand %p967_p9, %p964_p8 }
  0x18   :  { %972 = shalt.err (!%p969_p10)
}
  0x19   :  { %s973_s23 = scalar_lea.vmem %s1079_s20, 1536  ;;  %p978_p12 = scmp.lt.s32.totalorder %s1079_s20, %s1079_s20 }
  0x1a   :  { %p974_p11 = scmp.ne.s32.totalorder %s1079_s20, %s973_s23  ;;  %p979_p13 = scmp.lt.s32.totalorder %s973_s23, %s973_s23 }
  0x1c   :  { %p980_p0 = por %p979_p13, %p978_p12 }
  0x1e   :  { %p981_p1 = pnand %p980_p0, %p974_p11 }
  0x20   :  { %984 = shalt.err (!%p981_p1)
}
  0x21   :  { %31 = dma.hbm_to_vmem [thread:$0]  %s1297_s1, 1536, %s1079_s20, [#allocation3], %s1013_s29, %s1013_s29, %s1014_s30  }
  0x22   :  { %s1015_s24 = smov [#allocation6]   ;;  %s985_s28 = scalar_lea.hbm %s1303_s7, 2048 }
  0x23   :  { %s57_s25 = sshll.u32 %s1015_s24, 4  ;;  %p986_p2 = scmp.ne.s32.totalorder %s1303_s7, %s985_s28  ;;  %s58_s25 = int_to_ptr.vmem [resolvable:$true] %s57_s25 }
  0x24   :  { %p989_p3 = scmp.lt.u32.totalorder %s985_s28, %s1303_s7 }
  0x26   :  { %p991_p4 = pnand %p989_p3, %p986_p2 }
  0x28   :  { %994 = shalt.err (!%p991_p4)
}
  0x29   :  { %s995_s16 = scalar_lea.vmem %s58_s25, 2048  ;;  %p1000_p6 = scmp.lt.s32.totalorder %s58_s25, %s58_s25 }
  0x2a   :  { %p996_p5 = scmp.ne.s32.totalorder %s58_s25, %s995_s16  ;;  %p1001_p7 = scmp.lt.s32.totalorder %s995_s16, %s995_s16 }
  0x2c   :  { %p1002_p8 = por %p1001_p7, %p1000_p6 }
  0x2e   :  { %p1003_p9 = pnand %p1002_p8, %p996_p5 }
  0x30   :  { %1006 = shalt.err (!%p1003_p9)
}
  0x31   :  { %63 = dma.hbm_to_vmem [thread:$0]  %s1303_s7, 2048, %s58_s25, [#allocation5], %s1013_s29, %s1013_s29, %s1014_s30  }
  0x32   :  { %1007 = dma.done.wait [#allocation3], 1536  }
  0x33   :  { %1008 = vsyncadd [#allocation3], 4294965760 }
  0x34   :  { %1009 = dma.done.wait [#allocation5], 4096  }
  0x35   :  { %1010 = vsyncadd [#allocation5], 4294963200  ;;  %v1016_v0 = vmov 0.0|0.0   ;;  %vm1017_vm0 = vmmov 0   ;;  %v1018_v1 = vmov 0.0   ;;  %v80_v2 = vld [vmem:[#allocation2] sm:$0xff] }
  0x36   :  { %819 = vmatprep.subr.bf16.mxu0 %v1016_v0  ;;  %676 = vmatprep.mubr.msk.f32.mxu0 %vm1017_vm0, %v1018_v1  ;;  %v81_v3 = vld [vmem:[#allocation2 + $0x8] sm:$0xff]  ;;  %v82_v4 = vld [vmem:[#allocation2 + $0x10] sm:$0xff]  ;;  %v83_v6 = vld [vmem:[#allocation2 + $0x18] sm:$0xff]  ;;  %vm99_vm1 = vcmask 785408   ;;  %vm557_vm6 = vcmask 15360  }
  0x37   :  { %837 = vmatprep.subr.bf16.mxu1 %v1016_v0  ;;  %711 = vmatprep.mubr.msk.f32.mxu1 %vm1017_vm0, %v1018_v1  ;;  %v820_v5 = vpack.c.bf16 %v81_v3, %v80_v2  ;;  %v823_v7 = vpack.c.bf16 %v83_v6, %v82_v4  ;;  %v84_v8 = vld [vmem:[#allocation2 + $0x20] sm:$0xff]  ;;  %v85_v9 = vld [vmem:[#allocation2 + $0x28] sm:$0xff]  ;;  %v178_v13 = vld [vmem:[%s1299_s3 + $0x10] sm:$0xff] }
  0x38   :  { %v176_v10 = vld [vmem:[%s1299_s3] sm:$0xff]  ;;  %v177_v11 = vld [vmem:[%s1299_s3 + $0x8] sm:$0xff]  ;;  %v179_v14 = vld [vmem:[%s1299_s3 + $0x18] sm:$0xff]  ;;  %v826_v15 = vpack.c.bf16 %v85_v9, %v84_v8 }
  0x39   :  { %821 = vmatpush3.bf16.msra.mxu0 %v820_v5  ;;  %v838_v12 = vpack.c.bf16 %v177_v11, %v176_v10  ;;  %v86_v16 = vld [vmem:[#allocation2 + $0x30] sm:$0xff]  ;;  %v841_v17 = vpack.c.bf16 %v179_v14, %v178_v13  ;;  %v87_v18 = vld [vmem:[#allocation2 + $0x38] sm:$0xff]  ;;  %v180_v19 = vld [vmem:[%s1299_s3 + $0x20] sm:$0xff] }
  0x3a   :  { %822 = vmatprep.subr.bf16.mxu0 %v1016_v0  ;;  %v181_v20 = vld [vmem:[%s1299_s3 + $0x28] sm:$0xff]  ;;  %v829_v21 = vpack.c.bf16 %v87_v18, %v86_v16  ;;  %v88_v22 = vld [vmem:[#allocation2 + $0x40] sm:$0xff]  ;;  %v182_v25 = vld [vmem:[%s1299_s3 + $0x30] sm:$0xff] }
  0x3b   :  { %839 = vmatpush3.bf16.msra.mxu1 %v838_v12  ;;  %v844_v23 = vpack.c.bf16 %v181_v20, %v180_v19  ;;  %v89_v24 = vld [vmem:[#allocation2 + $0x48] sm:$0xff]  ;;  %v183_v26 = vld [vmem:[%s1299_s3 + $0x38] sm:$0xff]  ;;  %v90_v28 = vld [vmem:[#allocation2 + $0x50] sm:$0xff] }
  0x3c   :  { %840 = vmatprep.subr.bf16.mxu1 %v1016_v0  ;;  %v832_v27 = vpack.c.bf16 %v89_v24, %v88_v22  ;;  %v847_v29 = vpack.c.bf16 %v183_v26, %v182_v25  ;;  %v91_v30 = vld [vmem:[#allocation2 + $0x58] sm:$0xff]  ;;  %v184_v31 = vld [vmem:[%s1299_s3 + $0x40] sm:$0xff]  ;;  %v185_v32 = vld [vmem:[%s1299_s3 + $0x48] sm:$0xff] }
  0x3d   :  { %824 = vmatpush3.bf16.msra.mxu0 %v823_v7  ;;  %v835_v33 = vpack.c.bf16 %v91_v30, %v90_v28  ;;  %v850_v34 = vpack.c.bf16 %v185_v32, %v184_v31  ;;  %v186_v35 = vld [vmem:[%s1299_s3 + $0x50] sm:$0xff]  ;;  %v187_v36 = vld [vmem:[%s1299_s3 + $0x58] sm:$0xff]  ;;  %v79_v37 = vld [vmem:[%s1296_s0] sm:$0xff] }
  0x3e   :  { %825 = vmatprep.subr.bf16.mxu0 %v1016_v0  ;;  %v853_v38 = vpack.c.bf16 %v187_v36, %v186_v35  ;;  %v188_v39 = vld [vmem:[%s1299_s3 + $0x60] sm:$0xff]  ;;  %v189_v40 = vld [vmem:[%s1299_s3 + $0x68] sm:$0xff]  ;;  %v190_v42 = vld [vmem:[%s1299_s3 + $0x70] sm:$0xff] }
  0x3f   :  { %842 = vmatpush3.bf16.msra.mxu1 %v841_v17  ;;  %v856_v41 = vpack.c.bf16 %v189_v40, %v188_v39  ;;  %v191_v43 = vld [vmem:[%s1299_s3 + $0x78] sm:$0xff]  ;;  %v272_v45 = vld [vmem:[#allocation4] sm:$0xff]  ;;  %v273_v46 = vld [vmem:[#allocation4 + $0x8] sm:$0xff] }
  0x40   :  { %843 = vmatprep.subr.bf16.mxu1 %v1016_v0  ;;  %v859_v44 = vpack.c.bf16 %v191_v43, %v190_v42  ;;  %v274_v47 = vld [vmem:[#allocation4 + $0x10] sm:$0xff]  ;;  %v862_v48 = vpack.c.bf16 %v273_v46, %v272_v45  ;;  %v275_v49 = vld [vmem:[#allocation4 + $0x18] sm:$0xff]  ;;  %v276_v51 = vld [vmem:[#allocation4 + $0x20] sm:$0xff] }
  0x41   :  { %827 = vmatpush3.bf16.msra.mxu0 %v826_v15  ;;  %v865_v50 = vpack.c.bf16 %v275_v49, %v274_v47  ;;  %v277_v52 = vld [vmem:[#allocation4 + $0x28] sm:$0xff]  ;;  %v278_v54 = vld [vmem:[#allocation4 + $0x30] sm:$0xff]  ;;  %v279_v55 = vld [vmem:[#allocation4 + $0x38] sm:$0xff] }
  0x42   :  { %828 = vmatprep.subr.bf16.mxu0 %v1016_v0  ;;  %v868_v53 = vpack.c.bf16 %v277_v52, %v276_v51  ;;  %v871_v56 = vpack.c.bf16 %v279_v55, %v278_v54  ;;  %v280_v57 = vld [vmem:[#allocation4 + $0x40] sm:$0xff]  ;;  %v281_v58 = vld [vmem:[#allocation4 + $0x48] sm:$0xff]  ;;  %v282_v60 = vld [vmem:[#allocation4 + $0x50] sm:$0xff] }
  0x43   :  { %845 = vmatpush3.bf16.msra.mxu1 %v844_v23  ;;  %v874_v59 = vpack.c.bf16 %v281_v58, %v280_v57  ;;  %v283_v61 = vld [vmem:[#allocation4 + $0x58] sm:$0xff]  ;;  %v284_v63 = vld [vmem:[#allocation4 + $0x60] sm:$0xff]  ;;  %v285_v2 = vld [vmem:[#allocation4 + $0x68] sm:$0xff] }
  0x44   :  { %846 = vmatprep.subr.bf16.mxu1 %v1016_v0  ;;  %v877_v62 = vpack.c.bf16 %v283_v61, %v282_v60  ;;  %v880_v3 = vpack.c.bf16 %v285_v2, %v284_v63  ;;  %v565_v4 = vld [vmem:[%s1298_s2] ss:$0 sm:$0xff]  ;;  %v286_v10 = vld [vmem:[#allocation4 + $0x70] sm:$0xff]  ;;  %v287_v11 = vld [vmem:[#allocation4 + $0x78] sm:$0xff] }
  0x45   :  { %830 = vmatpush3.bf16.msra.mxu0 %v829_v21  ;;  %v883_v12 = vpack.c.bf16 %v287_v11, %v286_v10  ;;  %v368_v13 = vld [vmem:[#allocation6] sm:$0xff]  ;;  %v369_v14 = vld [vmem:[#allocation6 + $0x8] sm:$0xff]  ;;  %v370_v15 = vld [vmem:[#allocation6 + $0x10] sm:$0xff] }
  0x46   :  { %831 = vmatprep.subr.bf16.mxu0 %v1016_v0  ;;  %v886_v16 = vpack.c.bf16 %v369_v14, %v368_v13  ;;  %v371_v17 = vld [vmem:[#allocation6 + $0x18] sm:$0xff]  ;;  %v372_v19 = vld [vmem:[#allocation6 + $0x20] sm:$0xff]  ;;  %v373_v20 = vld [vmem:[#allocation6 + $0x28] sm:$0xff] }
  0x47   :  { %848 = vmatpush3.bf16.msra.mxu1 %v847_v29  ;;  %v889_v18 = vpack.c.bf16 %v371_v17, %v370_v15  ;;  %v892_v21 = vpack.c.bf16 %v373_v20, %v372_v19  ;;  %v374_v22 = vld [vmem:[#allocation6 + $0x30] sm:$0xff]  ;;  %v375_v23 = vld [vmem:[#allocation6 + $0x38] sm:$0xff]  ;;  %v376_v25 = vld [vmem:[#allocation6 + $0x40] sm:$0xff] }
  0x48   :  { %849 = vmatprep.subr.bf16.mxu1 %v1016_v0  ;;  %v895_v24 = vpack.c.bf16 %v375_v23, %v374_v22  ;;  %v377_v26 = vld [vmem:[#allocation6 + $0x48] sm:$0xff]  ;;  %v378_v28 = vld [vmem:[#allocation6 + $0x50] sm:$0xff]  ;;  %v379_v29 = vld [vmem:[#allocation6 + $0x58] sm:$0xff] }
  0x49   :  { %833 = vmatpush3.bf16.msra.mxu0 %v832_v27  ;;  %v898_v27 = vpack.c.bf16 %v377_v26, %v376_v25  ;;  %v901_v30 = vpack.c.bf16 %v379_v29, %v378_v28  ;;  %v380_v31 = vld [vmem:[#allocation6 + $0x60] sm:$0xff]  ;;  %v381_v32 = vld [vmem:[#allocation6 + $0x68] sm:$0xff]  ;;  %v382_v40 = vld [vmem:[#allocation6 + $0x70] sm:$0xff] }
  0x4a   :  { %834 = vmatprep.subr.bf16.mxu0 %v1016_v0  ;;  %v464_v43 = vld [vmem:[%s1305_s9] sm:$0xff]  ;;  %v466_v45 = vld [vmem:[%s1305_s9 + $0x10] sm:$0xff]  ;;  %v469_v49 = vld [vmem:[%s1305_s9 + $0x28] sm:$0xff] }
  0x4b   :  { %851 = vmatpush3.bf16.msra.mxu1 %v850_v34  ;;  %v567_v34 = vld [vmem:[%s1300_s4] ss:$0 sm:$0xff]  ;;  %v470_v51 = vld [vmem:[%s1305_s9 + $0x30] sm:$0xff]  ;;  %v471_v52 = vld [vmem:[%s1305_s9 + $0x38] sm:$0xff] }
  0x4c   :  { %852 = vmatprep.subr.bf16.mxu1 %v1016_v0  ;;  %v472_v54 = vld [vmem:[%s1305_s9 + $0x40] sm:$0xff]  ;;  %v473_v55 = vld [vmem:[%s1305_s9 + $0x48] sm:$0xff]  ;;  %v474_v57 = vld [vmem:[%s1305_s9 + $0x50] sm:$0xff] }
  0x4d   :  { %836 = vmatpush3.bf16.msra.mxu0 %v835_v33  ;;  %v904_v33 = vpack.c.bf16 %v381_v32, %v380_v31  ;;  %v475_v58 = vld [vmem:[%s1305_s9 + $0x58] sm:$0xff]  ;;  %v476_v60 = vld [vmem:[%s1305_s9 + $0x60] sm:$0xff]  ;;  %v477_v61 = vld [vmem:[%s1305_s9 + $0x68] sm:$0xff] }
  0x4e   :  { %861 = vmatprep.subr.bf16.mxu0 %v1016_v0  ;;  %v568_v63 = vld [vmem:[%s1302_s6] ss:$0 sm:$0xff] }
  0x4f   :  { %854 = vmatpush3.bf16.msra.mxu1 %v853_v38  ;;  %v570_v15 = vld [vmem:[%s1306_s10] ss:$0 sm:$0xff] }
  0x50   :  { %677 = vmatmul.mubr.msk.f32.vlgmr.msra.gmra.mrb[0].mxu0 %vm99_vm1, %v79_v37  ;;  %855 = vmatprep.subr.bf16.mxu1 %v1016_v0 }
  0x51   :  { %746 = vmatprep.mubr.msk.f32.mxu0 %vm1017_vm0, %v1018_v1  ;;  %863 = vmatpush3.bf16.msra.mxu0 %v862_v48  ;;  %v468_v48 = vld [vmem:[%s1305_s9 + $0x20] sm:$0xff] }
  0x52   :  { %864 = vmatprep.subr.bf16.mxu0 %v1016_v0 }
  0x53   :  { %857 = vmatpush3.bf16.msra.mxu1 %v856_v41  ;;  %v383_v41 = vld [vmem:[#allocation6 + $0x78] sm:$0xff] }
  0x54   :  { %858 = vmatprep.subr.bf16.mxu1 %v1016_v0  ;;  %v907_v42 = vpack.c.bf16 %v383_v41, %v382_v40 }
  0x55   :  { %866 = vmatpush3.bf16.msra.mxu0 %v865_v50  ;;  %v916_v50 = vpack.c.bf16 %v469_v49, %v468_v48 }
  0x56   :  { %867 = vmatprep.subr.bf16.mxu0 %v1016_v0 }
  0x57   :  { %860 = vmatpush3.bf16.msra.mxu1 %v859_v44  ;;  %v465_v44 = vld [vmem:[%s1305_s9 + $0x8] sm:$0xff] }
  0x58   :  { %885 = vmatprep.subr.bf16.mxu1 %v1016_v0  ;;  %v910_v46 = vpack.c.bf16 %v465_v44, %v464_v43 }
  0x59   :  { %869 = vmatpush3.bf16.msra.mxu0 %v868_v53  ;;  %v919_v53 = vpack.c.bf16 %v471_v52, %v470_v51 }
  0x5a   :  { %870 = vmatprep.subr.bf16.mxu0 %v1016_v0 }
  0x5d   :  { %872 = vmatpush3.bf16.msra.mxu0 %v871_v56  ;;  %v922_v56 = vpack.c.bf16 %v473_v55, %v472_v54 }
  0x5e   :  { %873 = vmatprep.subr.bf16.mxu0 %v1016_v0 }
  0x61   :  { %875 = vmatpush3.bf16.msra.mxu0 %v874_v59  ;;  %v925_v59 = vpack.c.bf16 %v475_v58, %v474_v57 }
  0x62   :  { %876 = vmatprep.subr.bf16.mxu0 %v1016_v0 }
  0x65   :  { %878 = vmatpush3.bf16.msra.mxu0 %v877_v62  ;;  %v928_v62 = vpack.c.bf16 %v477_v61, %v476_v60 }
  0x66   :  { %879 = vmatprep.subr.bf16.mxu0 %v1016_v0 }
  0x69   :  { %881 = vmatpush3.bf16.msra.mxu0 %v880_v3 }
  0x6a   :  { %882 = vmatprep.subr.bf16.mxu0 %v1016_v0 }
  0x6d   :  { %884 = vmatpush3.bf16.msra.mxu0 %v883_v12 }
  0x6e   :  { %909 = vmatprep.subr.bf16.mxu0 %v1016_v0 }
 0x123   :  { %v169_v5 = vpop.f32.mrb[0].mxu0 }
 0x124   :  { %v170_v6 = vadd.f32 %v565_v4, %v169_v5  ;;  %v678_v7 = vpop.f32.mrb[1].mxu0 }
 0x125   :  { %v478_v7 = vld [vmem:[%s1305_s9 + $0x70] sm:$0xff] }
 0x126   :  { %v174_v8 = vmul.f32 0.22916667, %v170_v6  ;;  %vm173_vm2 = vcmp.ge.f32.partialorder %v170_v6, 0.0 }
 0x128   :  { %v175_v9 = vsel %vm173_vm2, %v170_v6, %v174_v8  ;;  %v479_v8 = vld [vmem:[%s1305_s9 + $0x78] sm:$0xff] }
 0x129   :  { %712 = vmatmul.mubr.f32.vlgmr.msra.gmra.mrb[0].mxu1 %v175_v9  ;;  %v569_v9 = vld [vmem:[%s1304_s8] ss:$0 sm:$0xff] }
 0x12a   :  { %781 = vmatprep.mubr.msk.f32.mxu1 %vm1017_vm0, %v1018_v1  ;;  %887 = vmatpush3.bf16.msra.mxu1 %v886_v16 }
 0x12b   :  { %888 = vmatprep.subr.bf16.mxu1 %v1016_v0 }
 0x12e   :  { %890 = vmatpush3.bf16.msra.mxu1 %v889_v18 }
 0x12f   :  { %891 = vmatprep.subr.bf16.mxu1 %v1016_v0 }
 0x132   :  { %893 = vmatpush3.bf16.msra.mxu1 %v892_v21 }
 0x133   :  { %894 = vmatprep.subr.bf16.mxu1 %v1016_v0 }
 0x136   :  { %896 = vmatpush3.bf16.msra.mxu1 %v895_v24 }
 0x137   :  { %897 = vmatprep.subr.bf16.mxu1 %v1016_v0 }
 0x13a   :  { %899 = vmatpush3.bf16.msra.mxu1 %v898_v27 }
 0x13b   :  { %900 = vmatprep.subr.bf16.mxu1 %v1016_v0 }
 0x13e   :  { %902 = vmatpush3.bf16.msra.mxu1 %v901_v30 }
 0x13f   :  { %903 = vmatprep.subr.bf16.mxu1 %v1016_v0 }
 0x142   :  { %905 = vmatpush3.bf16.msra.mxu1 %v904_v33 }
 0x143   :  { %906 = vmatprep.subr.bf16.mxu1 %v1016_v0 }
 0x146   :  { %908 = vmatpush3.bf16.msra.mxu1 %v907_v42 }
 0x1fc   :  { %v265_v35 = vpop.f32.mrb[0].mxu1 }
 0x1fd   :  { %v266_v36 = vadd.f32 %v567_v34, %v265_v35  ;;  %v713_v37 = vpop.f32.mrb[1].mxu1 }
 0x1ff   :  { %vm269_vm3 = vcmp.ge.f32.partialorder %v266_v36, 0.0  ;;  %v270_v38 = vmul.f32 0.22916667, %v266_v36 }
 0x201   :  { %v271_v39 = vsel %vm269_vm3, %v266_v36, %v270_v38 }
 0x202   :  { %747 = vmatmul.mubr.f32.vlgmr.msra.gmra.mrb[2].mxu0 %v271_v39 }
 0x203   :  { %816 = vmatprep.mubr.msk.f32.mxu0 %vm1017_vm0, %v1018_v1  ;;  %v467_v1 = vld [vmem:[%s1305_s9 + $0x18] sm:$0xff]  ;;  %911 = vmatpush3.bf16.msra.mxu0 %v910_v46 }
 0x204   :  { %v913_v47 = vpack.c.bf16 %v467_v1, %v466_v45  ;;  %912 = vmatprep.subr.bf16.mxu0 %v1016_v0 }
 0x207   :  { %914 = vmatpush3.bf16.msra.mxu0 %v913_v47 }
 0x208   :  { %915 = vmatprep.subr.bf16.mxu0 %v1016_v0 }
 0x20b   :  { %917 = vmatpush3.bf16.msra.mxu0 %v916_v50 }
 0x20c   :  { %918 = vmatprep.subr.bf16.mxu0 %v1016_v0 }
 0x20f   :  { %920 = vmatpush3.bf16.msra.mxu0 %v919_v53 }
 0x210   :  { %921 = vmatprep.subr.bf16.mxu0 %v1016_v0 }
 0x213   :  { %923 = vmatpush3.bf16.msra.mxu0 %v922_v56 }
 0x214   :  { %924 = vmatprep.subr.bf16.mxu0 %v1016_v0 }
 0x217   :  { %926 = vmatpush3.bf16.msra.mxu0 %v925_v59 }
 0x218   :  { %927 = vmatprep.subr.bf16.mxu0 %v1016_v0 }
 0x21b   :  { %929 = vmatpush3.bf16.msra.mxu0 %v928_v62 }
 0x21c   :  { %930 = vmatprep.subr.bf16.mxu0 %v1016_v0  ;;  %v931_v0 = vpack.c.bf16 %v479_v8, %v478_v7 }
 0x21f   :  { %932 = vmatpush3.bf16.msra.mxu0 %v931_v0 }
 0x2d5   :  { %v361_v2 = vpop.f32.mrb[2].mxu0 }
 0x2d6   :  { %v362_v3 = vadd.f32 %v568_v63, %v361_v2  ;;  %v748_v4 = vpop.f32.mrb[3].mxu0 }
 0x2d8   :  { %vm365_vm4 = vcmp.ge.f32.partialorder %v362_v3, 0.0  ;;  %v366_v5 = vmul.f32 0.22916667, %v362_v3 }
 0x2da   :  { %v367_v6 = vsel %vm365_vm4, %v362_v3, %v366_v5 }
 0x2db   :  { %782 = vmatmul.mubr.f32.vlgmr.msra.gmra.mrb[2].mxu1 %v367_v6 }
 0x3ae   :  { %v457_v10 = vpop.f32.mrb[2].mxu1 }
 0x3af   :  { %v458_v11 = vadd.f32 %v569_v9, %v457_v10  ;;  %v783_v12 = vpop.f32.mrb[3].mxu1 }
 0x3b1   :  { %vm461_vm5 = vcmp.ge.f32.partialorder %v458_v11, 0.0  ;;  %v462_v13 = vmul.f32 0.22916667, %v458_v11 }
 0x3b3   :  { %v463_v14 = vsel %vm461_vm5, %v458_v11, %v462_v13 }
 0x3b4   :  { %817 = vmatmul.mubr.f32.vlgmr.msra.gmra.mrb[4].mxu0 %v463_v14 }
 0x487   :  { %v553_v16 = vpop.f32.mrb[4].mxu0 }
 0x488   :  { %v554_v17 = vadd.f32 %v570_v15, %v553_v16  ;;  %v818_v18 = vpop.f32.mrb[5].mxu0 }
 0x48a   :  { %558 = vst.msk [vmem:[%s1307_s11] sm:$0xff] %vm557_vm6, %v554_v17 }
 0x48b   :  { %563 = vsyncpa [#allocation3], 1 }
 0x48c   :  { %564 = vsyncpa [#allocation5], 1 }

</bundles_post_ra>
